<compile_context>
chip_gen: v7x
topology: tpu7x:2x2x1
jax: 0.10.0
libtpu: 0.0.40
codegen_flags: <defaults>
</compile_context>

<pallas_src>
import math
import numpy as np
import jax
import jax.numpy as jnp
from jax.experimental import pallas as pl
from jax.experimental.pallas import tpu as pltpu

_MIB = 1024 * 1024
# xw (plus its pipeline double-buffer) must stay comfortably inside the VMEM
# budget on all generations; above this we stream xw per contraction tile.
_XW_RESIDENT_BYTES = 8 * _MIB
_TK_CANDIDATES = (2048, 1024, 512, 384, 256, 128)   # divisors of padded K
_TM1_CANDIDATES = (512, 256, 128)                   # stage-1 row tiles


def _round_up(a, m):
    return (a + m - 1) // m * m


# ---------------------------------------------------------------------------
# Stage 1: xw = x @ W + b   (small GEMM, tiled over node rows, f32 output)
# ---------------------------------------------------------------------------
def _xw_kernel(x_ref, w_ref, b_ref, xw_ref):
    xw = jnp.dot(x_ref[...], w_ref[...], preferred_element_type=jnp.float32)
    xw_ref[...] = xw + b_ref[...]            # (1, F_pad) broadcasts over rows


# ---------------------------------------------------------------------------
# Stage 2: out = G @ xw     (dominant N^2 GEMM)
# ---------------------------------------------------------------------------
def _gxw_resident_kernel(g_ref, xw_ref, out_ref, acc_ref):
    """xw fully VMEM-resident (constant block); slice the k-chunk in-kernel."""
    k = pl.program_id(1)

    @pl.when(k == 0)
    def _init():
        acc_ref[...] = jnp.zeros_like(acc_ref)

    tk = g_ref.shape[1]                       # static contraction tile
    start = pl.multiple_of(k * tk, tk)
    acc_ref[...] += jnp.dot(g_ref[...], xw_ref[pl.ds(start, tk), :],
                            preferred_element_type=jnp.float32)

    @pl.when(k == pl.num_programs(1) - 1)
    def _store():
        out_ref[...] = acc_ref[...].astype(out_ref.dtype)


def _gxw_stream_kernel(g_ref, xw_ref, out_ref, acc_ref):
    """Fallback: xw streamed per contraction tile (very large graphs)."""
    k = pl.program_id(1)

    @pl.when(k == 0)
    def _init():
        acc_ref[...] = jnp.zeros_like(acc_ref)

    acc_ref[...] += jnp.dot(g_ref[...], xw_ref[...],
                            preferred_element_type=jnp.float32)

    @pl.when(k == pl.num_programs(1) - 1)
    def _store():
        out_ref[...] = acc_ref[...].astype(out_ref.dtype)


def _choose_tiles(n):
    """Return (n_row_pad, tm, n_k_pad, tk) for the G @ xw matmul.

    Small graphs: single block (block == full dim is always layout-legal).
    Large graphs: TM up to 512 rows but capped so the 'parallel' row axis has
    >= 4 tiles (keeps both v7x TensorCores busy); contraction padded only to a
    multiple of 128 and TK chosen as the largest candidate dividing it, so G
    padding (and the extra HBM pass of jnp.pad) is avoided for aligned N.
    """
    if n <= 512:
        return n, n, n, n
    tm = 512
    while tm > 128 and n < 4 * tm:
        tm //= 2
    n_row_pad = _round_up(n, tm)
    n_k_pad = _round_up(n, 128)
    tk = n_k_pad
    for c in _TK_CANDIDATES:
        if n_k_pad % c == 0:
            tk = c
            break
    return n_row_pad, tm, n_k_pad, tk


def hgnn_conv(x, G, weight, bias=None):
    """Pallas implementation of HGNN_conv.forward: G @ (x @ W + b).

    x: [N, F_in], G: [N, N], weight: [F_in, F_out], bias: [F_out] or None.
    Returns [N, F_out] in x.dtype.  No dtype cast of G is performed here
    (cast at the producer if you want bf16-at-rest G).
    """
    N, F_in = x.shape
    assert G.shape == (N, N), "G must be [N, N]"
    F_out = weight.shape[1]
    out_dtype = x.dtype

    F_pad = _round_up(max(F_out, 128), 128)
    N_row_pad, TM, N_k_pad, TK = _choose_tiles(N)

    # ---- tiny parameters: pad F_out columns to a lane-dense F_pad ---------
    w_pad = jnp.pad(weight, ((0, 0), (0, F_pad - F_out)))
    if bias is None:
        b_pad = jnp.zeros((1, F_pad), dtype=jnp.float32)
    else:
        b_pad = jnp.pad(bias.astype(jnp.float32),
                        (0, F_pad - F_out)).reshape(1, F_pad)

    # ---- inputs: pad only when needed; never copy/cast G for aligned N ----
    x_p = x if N_k_pad == N else jnp.pad(x, ((0, N_k_pad - N), (0, 0)))
    if N_row_pad == N and N_k_pad == N:
        G_p = G
    else:
        # Padded x rows give xw rows equal to the bias (nonzero); G's zero
        # padded *columns* cancel them.  Zero padded *rows* only produce
        # padded output rows that are sliced away below.
        G_p = jnp.pad(G, ((0, N_row_pad - N), (0, N_k_pad - N)))

    g_bytes = jnp.dtype(G.dtype).itemsize
    x_bytes = jnp.dtype(x.dtype).itemsize
    w_bytes = jnp.dtype(weight.dtype).itemsize
    out_bytes = jnp.dtype(out_dtype).itemsize
    xw_bytes = 4  # xw kept in f32

    # ----------------------- stage 1: xw = x @ W + b -----------------------
    TM1 = N_k_pad
    for c in _TM1_CANDIDATES:
        if N_k_pad % c == 0:
            TM1 = c
            break

    xw = pl.pallas_call(
        _xw_kernel,
        out_shape=jax.ShapeDtypeStruct((N_k_pad, F_pad), jnp.float32),
        grid_spec=pltpu.PrefetchScalarGridSpec(
            num_scalar_prefetch=0,
            grid=(N_k_pad // TM1,),
            in_specs=[
                pl.BlockSpec((TM1, F_in), lambda i: (i, 0)),
                pl.BlockSpec((F_in, F_pad), lambda i: (0, 0)),   # invariant
                pl.BlockSpec((1, F_pad), lambda i: (0, 0)),      # invariant
            ],
            out_specs=pl.BlockSpec((TM1, F_pad), lambda i: (i, 0)),
        ),
        compiler_params=pltpu.CompilerParams(
            dimension_semantics=("parallel",)),
        cost_estimate=pl.CostEstimate(
            flops=2 * N_k_pad * F_in * F_pad,
            transcendentals=0,
            bytes_accessed=(N_k_pad * F_in * x_bytes
                            + F_in * F_pad * w_bytes
                            + F_pad * 4
                            + N_k_pad * F_pad * xw_bytes)),
    )(x_p, w_pad, b_pad)

    # ----------------------- stage 2: out = G @ xw -------------------------
    n_row_tiles = N_row_pad // TM
    n_k_tiles = N_k_pad // TK

    resident = (n_k_tiles > 1
                and N_k_pad * F_pad * xw_bytes <= _XW_RESIDENT_BYTES)
    if resident:
        kernel = _gxw_resident_kernel
        xw_spec = pl.BlockSpec((N_k_pad, F_pad), lambda i, k: (0, 0))
        xw_block_rows = N_k_pad
        xw_read = N_k_pad * F_pad * xw_bytes
    else:
        kernel = _gxw_stream_kernel
        xw_spec = pl.BlockSpec((TK, F_pad), lambda i, k: (k, 0))
        xw_block_rows = TK
        refetch = n_row_tiles if n_k_tiles > 1 else 1
        xw_read = refetch * N_k_pad * F_pad * xw_bytes

    # Explicit VMEM budget: double-buffered G and xw blocks + f32 accumulator
    # + double-buffered output block, with 25% + 1 MiB headroom.  Clamped to
    # [16 MiB, 64 MiB] so it fits v7x's 64 MiB/TC and raises v5e's 16 MiB
    # default when the bigger tiles need it.
    vmem_need = (2 * TM * TK * g_bytes
                 + 2 * xw_block_rows * F_pad * xw_bytes
                 + TM * F_pad * 4
                 + 2 * TM * F_pad * out_bytes)
    vmem_limit = int(min(64 * _MIB,
                         max(vmem_need * 5 // 4 + _MIB, 16 * _MIB)))

    out_p = pl.pallas_call(
        kernel,
        out_shape=jax.ShapeDtypeStruct((N_row_pad, F_pad), out_dtype),
        grid_spec=pltpu.PrefetchScalarGridSpec(
            num_scalar_prefetch=0,
            grid=(n_row_tiles, n_k_tiles),
            in_specs=[
                pl.BlockSpec((TM, TK), lambda i, k: (i, k)),
                xw_spec,
            ],
            out_specs=pl.BlockSpec((TM, F_pad), lambda i, k: (i, 0)),
            scratch_shapes=[pltpu.VMEM((TM, F_pad), jnp.float32)],
        ),
        compiler_params=pltpu.CompilerParams(
            dimension_semantics=("parallel", "arbitrary"),
            vmem_limit_bytes=vmem_limit),
        cost_estimate=pl.CostEstimate(
            flops=2 * N_row_pad * N_k_pad * F_pad,
            transcendentals=0,
            bytes_accessed=(N_row_pad * N_k_pad * g_bytes
                            + xw_read
                            + N_row_pad * F_pad * out_bytes)),
    )(G_p, xw)

    return out_p[:N, :F_out]


def _rel_err(a, b):
    a = np.asarray(a, np.float64)
    b = np.asarray(b, np.float64)
    return float(np.max(np.abs(a - b)) / (np.max(np.abs(b)) + 1e-12))


if __name__ == "__main__":
    # Shapes consistent with the module: N nodes, in_ft -> out_ft.
    N, in_ft, out_ft = 1024, 32, 8
    key = jax.random.PRNGKey(0)
    kx, kg, kw, kb = jax.random.split(key, 4)

    # Deterministic parameter init mirroring reset_parameters():
    # uniform(-stdv, stdv) with stdv = 1/sqrt(out_ft).
    stdv = 1.0 / math.sqrt(out_ft)
    weight = jax.random.uniform(kw, (in_ft, out_ft), jnp.float32, -stdv, stdv)
    bias = jax.random.uniform(kb, (out_ft,), jnp.float32, -stdv, stdv)

    x = jax.random.normal(kx, (N, in_ft), jnp.float32)
    G = jax.random.normal(kg, (N, N), jnp.float32) / math.sqrt(N)

    x64 = np.asarray(x, np.float64)
    G64 = np.asarray(G, np.float64)
    w64 = np.asarray(weight, np.float64)
    b64 = np.asarray(bias, np.float64)
    ref = G64 @ (x64 @ w64 + b64)

    # 1) Aligned N: no G pad/copy, single contraction tile, 4 row tiles.
    out = jax.block_until_ready(hgnn_conv(x, G, weight, bias))
    assert out.shape == (N, out_ft)
    assert _rel_err(out, ref) < 1e-3, _rel_err(out, ref)

    # 2) Multi-k-tile case exercising the VMEM-resident xw kernel (N=1280:
    #    5 row tiles x 5 contraction tiles, no padding needed).
    Nr = 1280
    xr = jax.random.normal(jax.random.PRNGKey(2), (Nr, in_ft), jnp.float32)
    Gr = jax.random.normal(jax.random.PRNGKey(3), (Nr, Nr), jnp.float32)
    Gr = Gr / math.sqrt(Nr)
    out_r = jax.block_until_ready(hgnn_conv(xr, Gr, weight, bias))
    ref_r = (np.asarray(Gr, np.float64)
             @ (np.asarray(xr, np.float64) @ w64 + b64))
    assert out_r.shape == (Nr, out_ft)
    assert _rel_err(out_r, ref_r) < 1e-3, _rel_err(out_r, ref_r)

    # 3) Small-graph + bias=None path (single-block tiles).
    Ns = 16
    xs = x[:Ns]
    Gs = jax.random.normal(jax.random.PRNGKey(1), (Ns, Ns), jnp.float32)
    out_s = jax.block_until_ready(hgnn_conv(xs, Gs, weight, None))
    ref_s = np.asarray(Gs, np.float64) @ (np.asarray(xs, np.float64) @ w64)
    assert out_s.shape == (Ns, out_ft)
    assert _rel_err(out_s, ref_s) < 1e-3, _rel_err(out_s, ref_s)

    # 4) Unaligned N exercising the minimal-pad + zero-column cancellation.
    Nu = 1000
    xu = x[:Nu]
    Gu = G[:Nu, :Nu]
    out_u = jax.block_until_ready(hgnn_conv(xu, Gu, weight, bias))
    ref_u = G64[:Nu, :Nu] @ (x64[:Nu] @ w64 + b64)
    assert out_u.shape == (Nu, out_ft)
    assert _rel_err(out_u, ref_u) < 1e-3, _rel_err(out_u, ref_u)

    print("KERNEL_OK")
</pallas_src>

<mosaic_0001>
module attributes {stable_mosaic.version = 11 : i64} {
  func.func @_xw_kernel(%arg0: i32, %arg1: memref<512x32xf32, #tpu.memory_space<vmem>>, %arg2: memref<32x128xf32, #tpu.memory_space<vmem>>, %arg3: memref<1x128xf32, #tpu.memory_space<vmem>>, %arg4: memref<512x128xf32, #tpu.memory_space<vmem>>) attributes {dimension_semantics = [#tpu.dimension_semantics<parallel>], iteration_bounds = array<i64: 2>, scalar_prefetch = 0 : i64, scratch_operands = 0 : i64, tpu.core_type = #tpu.core_type<tc>, window_params = [{transform_indices = @transform_0, window_bounds = array<i64: 512, 32>}, {pipeline_mode = #tpu.pipeline_mode<synchronous>, transform_indices = @transform_1, window_bounds = array<i64: 32, 128>}, {pipeline_mode = #tpu.pipeline_mode<synchronous>, transform_indices = @transform_2, window_bounds = array<i64: 1, 128>}, {transform_indices = @transform_3, window_bounds = array<i64: 512, 128>}]} {
    %c0 = arith.constant 0 : index
    %c0_0 = arith.constant 0 : index
    %0 = vector.load %arg1[%c0, %c0_0] : memref<512x32xf32, #tpu.memory_space<vmem>>, vector<512x32xf32>
    %c0_1 = arith.constant 0 : index
    %c0_2 = arith.constant 0 : index
    %1 = vector.load %arg2[%c0_1, %c0_2] : memref<32x128xf32, #tpu.memory_space<vmem>>, vector<32x128xf32>
    %cst = arith.constant dense<0.000000e+00> : vector<512x128xf32>
    %2 = tpu.matmul %0, %1, %cst {dimension_numbers = #tpu.dot_dimension_numbers<[1], [0], [0], [1], [0, 0, 1, 1], [], []>} : vector<512x32xf32>, vector<32x128xf32>, vector<512x128xf32> -> vector<512x128xf32>
    %c0_3 = arith.constant 0 : index
    %c0_4 = arith.constant 0 : index
    %3 = vector.load %arg3[%c0_3, %c0_4] : memref<1x128xf32, #tpu.memory_space<vmem>>, vector<1x128xf32>
    %4 = vector.broadcast %3 : vector<1x128xf32> to vector<512x128xf32>
    %5 = arith.addf %2, %4 : vector<512x128xf32>
    %c0_5 = arith.constant 0 : index
    %c0_6 = arith.constant 0 : index
    %6 = vector.load %arg4[%c0_5, %c0_6] : memref<512x128xf32, #tpu.memory_space<vmem>>, vector<512x128xf32>
    tpu.vector_store %arg4[%c0_5, %c0_6], %5 {strides = array<i32>} : memref<512x128xf32, #tpu.memory_space<vmem>>, vector<512x128xf32>,
    return
  }
  func.func @transform_0(%arg0: i32) -> (i32, i32) {
    %c0_i32 = arith.constant 0 : i32
    %c0_i32_0 = arith.constant 0 : i32
    return %arg0, %c0_i32 : i32, i32
  }
  func.func @transform_1(%arg0: i32) -> (i32, i32) {
    %c0_i32 = arith.constant 0 : i32
    %c0_i32_0 = arith.constant 0 : i32
    %c0_i32_1 = arith.constant 0 : i32
    return %c0_i32, %c0_i32_0 : i32, i32
  }
  func.func @transform_2(%arg0: i32) -> (i32, i32) {
    %c0_i32 = arith.constant 0 : i32
    %c0_i32_0 = arith.constant 0 : i32
    %c0_i32_1 = arith.constant 0 : i32
    return %c0_i32, %c0_i32_0 : i32, i32
  }
  func.func @transform_3(%arg0: i32) -> (i32, i32) {
    %c0_i32 = arith.constant 0 : i32
    %c0_i32_0 = arith.constant 0 : i32
    return %arg0, %c0_i32 : i32, i32
  }
}

</mosaic_0001>

<bundles_post_ra>
// kernel: tpu_custom_call.1
= control target key start
LH: loop header
LB: loop body
LE: loop exit
PB: predicated region body
PF: predicated region fallthrough
CT: control target
= control target key end

     0   :  { %8 = vsyncpa [#allocation3], 0  ;;  %s1739_s0 = inlined_call_operand.vmem [shape: f32[1024,32], index: 0, kind: input, shape index: {}]   ;;  %s1740_s1 = inlined_call_operand.vmem [shape: f32[32,128], index: 1, kind: input, shape index: {}]   ;;  %s1741_s2 = inlined_call_operand.vmem [shape: f32[1,128], index: 2, kind: input, shape index: {}]   ;;  %s1742_s3 = inlined_call_operand.hbm [shape: f32[1024,128], index: 3, kind: output, shape index: {}]  }
   0x1   :  { %10 = vsyncpa [#allocation3 + $0x1], 0  ;;  %s1355_s12 = smov 0   ;;  %s1357_s13 = smov 0  }
   0x2   :  { %s1359_s14 = smov 0   ;;  %s1361_s15 = smov 0  }
   0x3 LB: > { %s1376_s16 = sadd.s32 4294967295, %s1330_s15   ;;  %s965_s17 = sadd.s32 4294967294, %s1330_s15   ;;  %s1330_s15 = sphi %s1361_s15, %s1748_s15   ;;  %s1326_s14 = sphi %s1359_s14, %s1747_s14   ;;  %s1322_s13 = sphi %s1357_s13, %s1746_s13   ;;  %s1318_s12 = sphi %s1355_s12, %s1745_s12  }
   0x4   : > { %s1380_s18 = sadd.s32 1, %s1330_s15   ;;  %s91_s19 = sadd.s32 1, %s1326_s14 }
   0x5   : > { %s88_s20 = ssub.s32 %s1330_s15, %s1380_s18  ;;  %p101_p0 = scmp.ne.s32.totalorder %s1326_s14, %s1322_s13 }
   0x6   : > { %p89_p1 = scmp.eq.s32.totalorder %s88_s20, 0  ;;  %p102_p2 = scmp.eq.s32.totalorder %s1376_s16, 1 }
   0x7   : > { %p107_p3 = scmp.ne.s32.totalorder %s1322_s13, %s1318_s12  ;;  %p108_p4 = scmp.eq.s32.totalorder %s965_s17, 1 }
   0x8   : > { %s1391_s21 = scalar_select %p89_p1, %s1326_s14, %s91_s19  }
   0x9   : > { %p1393_p5 = por %p102_p2, %p101_p0  ;;  %p1397_p6 = por %p108_p4, %p107_p3 }
   0xa   : > { %p968_p7 = scmp.ge.s32.totalorder %s1330_s15, 1  ;;  %p141_p8 = scmp.lt.s32.totalorder %s1330_s15, 3 }
   0xc   : > { %p142_p9 = pnand %p968_p7, %p141_p8 }
   0xd   : > { %v236_v0 = vld [vmem:[%s1740_s1] sm:$0xff] (!%p142_p9)  ;;  %v237_v1 = vld [vmem:[%s1740_s1 + $0x8] sm:$0xff] (!%p142_p9)  ;;  %v238_v2 = vld [vmem:[%s1740_s1 + $0x10] sm:$0xff] (!%p142_p9)  ;;  %s970_s30 = sshll.u32 (!%p142_p9), %s1376_s16, 6  ;;  %vm247_vm0 = vcmask (!%p142_p9), 261120   ;;  %s162_s10 = sand.u32 (!%p142_p9), 1, %s1322_s13  }
   0xe   : > { %145 = sbr.rel (%p142_p9) target bundleno = 317 (0x13d), region = 32  ;;  %v1215_v3 = vpack.c.bf16 (!%p142_p9), %v237_v1, %v236_v0  ;;  %v239_v4 = vld [vmem:[%s1740_s1 + $0x18] sm:$0xff] (!%p142_p9)  ;;  %p166_p10 = scmp.lt.s32.totalorder (!%p142_p9), %s970_s30, 127 }
   0xf   : > { %v1219_v5 = vpack.c.bf16 (!%p142_p9), %v239_v4, %v238_v2  ;;  %s969_s11 = sshll.u32 (!%p142_p9), %s162_s10, 9  ;;  %s1042_s24 = sshll.u32 (!%p142_p9), %s1376_s16, 13 }
  0x10   : > { %1216 = vmatprep.subr.bf16.mxu0 (!%p142_p9), %v1215_v3  ;;  %1223 = vmatprep.subr.bf16.mxu1 (!%p142_p9), %v1215_v3  ;;  %s1561_s20 = scalar_lea.vmem (!%p142_p9), [#allocation2], %s969_s11  ;;  %s1686_s27 = scalar_lea.hbm (!%p142_p9), %s1742_s3, %s1042_s24 }
  0x11   : > { %1218 = vmatpush3.bf16.msra.mxu0 (!%p142_p9), %v1215_v3  ;;  %1225 = vmatpush3.bf16.msra.mxu1 (!%p142_p9), %v1215_v3  ;;  %s903_s25 = sshll.u32 (!%p142_p9), %s1561_s20, 4  ;;  %s1698_s28 = scalar_lea.sflag (!%p142_p9), [#allocation3], %s162_s10  ;;  %s1688_s25 = int_to_ptr.vmem [resolvable:$true] %s903_s25 }
  0x12   : > { %1220 = vmatprep.subr.bf16.mxu0 (!%p142_p9), %v1219_v5  ;;  %1224 = vmatprep.subr.bf16.mxu1 (!%p142_p9), %v1219_v5  ;;  %s1268_s29 = scalar_lea.vmem (!%p142_p9), %s1688_s25, 8192 }
  0x13   : > { %p1269_p11 = scmp.ne.s32.totalorder (!%p142_p9), %s1688_s25, %s1268_s29 }
  0x15   : > { %s1750_s30 = smov (!%p166_p10, %s970_s30), 127  ;;  %1222 = vmatpush3.bf16.msra.mxu0 %v1219_v5  ;;  %1226 = vmatpush3.bf16.msra.mxu1 %v1219_v5  ;;  %p1270_p12 = pnand %p1269_p11, %p1393_p5 }
  0x16   : > { %s971_s6 = sshll.u32 %s1750_s30, 3  ;;  %s1332_s30 = smov [#allocation2]  }
  0x17   : > { %s1419_s9 = scalar_lea.vmem %s1739_s0, %s971_s6  ;;  %p1271_p13 = pneg %p1270_p12 }
  0x18   : > { %v172_v6 = vld [vmem:[%s1419_s9] sm:$0xff]  ;;  %v173_v8 = vld [vmem:[%s1419_s9 + $0x8] sm:$0xff]  ;;  %v174_v10 = vld [vmem:[%s1419_s9 + $0x10] sm:$0xff]  ;;  %s1272_s4 = sshll.u32 %s1332_s30, 4  ;;  %s1273_s4 = int_to_ptr.vmem [resolvable:$false] %s1272_s4 }
  0x19   : > { %v204_v7 = vld [vmem:[%s1419_s9 + $0x100] sm:$0xff]  ;;  %v205_v9 = vld [vmem:[%s1419_s9 + $0x108] sm:$0xff]  ;;  %1119 = vmatprep.mubr.msk.f32.mxu0 %vm247_vm0, %v172_v6  ;;  %v206_v11 = vld [vmem:[%s1419_s9 + $0x110] sm:$0xff]  ;;  %s1274_s5 = scalar_lea.vmem %s1273_s4, 16384  ;;  %p1275_p0 = scmp.lt.s32.totalorder %s1688_s25, %s1273_s4 }
  0x1a   : > { %1167 = vmatprep.mubr.msk.f32.mxu1 %vm247_vm0, %v204_v7  ;;  %1120 = vmatmul.mubr.msk.f32.vlgmr.msra.gmra.mrb[0].mxu0 %vm247_vm0, %v173_v8  ;;  %v175_v12 = vld [vmem:[%s1419_s9 + $0x18] sm:$0xff]  ;;  %v176_v14 = vld [vmem:[%s1419_s9 + $0x20] sm:$0xff]  ;;  %v177_v16 = vld [vmem:[%s1419_s9 + $0x28] sm:$0xff]  ;;  %p1276_p1 = scmp.lt.s32.totalorder %s1274_s5, %s1268_s29 }
  0x1b   : > { %1168 = vmatmul.mubr.msk.f32.vlgmr.msra.gmra.mrb[0].mxu1 %vm247_vm0, %v205_v9  ;;  %1122 = vmatprep.mubr.msk.f32.mxu0 %vm247_vm0, %v174_v10  ;;  %v207_v13 = vld [vmem:[%s1419_s9 + $0x118] sm:$0xff]  ;;  %v208_v15 = vld [vmem:[%s1419_s9 + $0x120] sm:$0xff]  ;;  %v209_v17 = vld [vmem:[%s1419_s9 + $0x128] sm:$0xff] }
  0x1c   : > { %1170 = vmatprep.mubr.msk.f32.mxu1 %vm247_vm0, %v206_v11  ;;  %v178_v18 = vld [vmem:[%s1419_s9 + $0x30] sm:$0xff]  ;;  %v179_v20 = vld [vmem:[%s1419_s9 + $0x38] sm:$0xff]  ;;  %v180_v22 = vld [vmem:[%s1419_s9 + $0x40] sm:$0xff]  ;;  %p1277_p2 = por %p1276_p1, %p1275_p0 }
  0x1d   : > { %v210_v19 = vld [vmem:[%s1419_s9 + $0x130] sm:$0xff]  ;;  %v211_v21 = vld [vmem:[%s1419_s9 + $0x138] sm:$0xff]  ;;  %v212_v23 = vld [vmem:[%s1419_s9 + $0x140] sm:$0xff] }
  0x1e   : > { %1123 = vmatmul.mubr.msk.f32.gmra.mrb[2].mxu0 %vm247_vm0, %v175_v12  ;;  %v181_v24 = vld [vmem:[%s1419_s9 + $0x48] sm:$0xff]  ;;  %v182_v26 = vld [vmem:[%s1419_s9 + $0x50] sm:$0xff]  ;;  %v183_v28 = vld [vmem:[%s1419_s9 + $0x58] sm:$0xff]  ;;  %p1278_p3 = pnand %p1277_p2, %p1271_p13 }
  0x1f   : > { %1171 = vmatmul.mubr.msk.f32.gmra.mrb[2].mxu1 %vm247_vm0, %v207_v13  ;;  %1125 = vmatprep.mubr.msk.f32.mxu0 %vm247_vm0, %v176_v14  ;;  %v213_v25 = vld [vmem:[%s1419_s9 + $0x148] sm:$0xff]  ;;  %v214_v27 = vld [vmem:[%s1419_s9 + $0x150] sm:$0xff]  ;;  %v215_v29 = vld [vmem:[%s1419_s9 + $0x158] sm:$0xff] }
  0x20   : > { %1173 = vmatprep.mubr.msk.f32.mxu1 %vm247_vm0, %v208_v15  ;;  %v184_v30 = vld [vmem:[%s1419_s9 + $0x60] sm:$0xff]  ;;  %v185_v32 = vld [vmem:[%s1419_s9 + $0x68] sm:$0xff]  ;;  %v186_v34 = vld [vmem:[%s1419_s9 + $0x70] sm:$0xff] }
  0x21   : > { %v216_v31 = vld [vmem:[%s1419_s9 + $0x160] sm:$0xff]  ;;  %v217_v33 = vld [vmem:[%s1419_s9 + $0x168] sm:$0xff]  ;;  %v218_v35 = vld [vmem:[%s1419_s9 + $0x170] sm:$0xff] }
  0x22   : > { %1126 = vmatmul.mubr.msk.f32.gmra.mrb[4].mxu0 %vm247_vm0, %v177_v16  ;;  %v187_v36 = vld [vmem:[%s1419_s9 + $0x78] sm:$0xff]  ;;  %v188_v38 = vld [vmem:[%s1419_s9 + $0x80] sm:$0xff]  ;;  %v189_v40 = vld [vmem:[%s1419_s9 + $0x88] sm:$0xff] }
  0x23   : > { %1174 = vmatmul.mubr.msk.f32.gmra.mrb[4].mxu1 %vm247_vm0, %v209_v17  ;;  %1128 = vmatprep.mubr.msk.f32.mxu0 %vm247_vm0, %v178_v18  ;;  %v219_v37 = vld [vmem:[%s1419_s9 + $0x178] sm:$0xff]  ;;  %v220_v39 = vld [vmem:[%s1419_s9 + $0x180] sm:$0xff]  ;;  %v221_v41 = vld [vmem:[%s1419_s9 + $0x188] sm:$0xff] }
  0x24   : > { %1176 = vmatprep.mubr.msk.f32.mxu1 %vm247_vm0, %v210_v19  ;;  %v190_v42 = vld [vmem:[%s1419_s9 + $0x90] sm:$0xff]  ;;  %v191_v44 = vld [vmem:[%s1419_s9 + $0x98] sm:$0xff]  ;;  %v192_v46 = vld [vmem:[%s1419_s9 + $0xa0] sm:$0xff] }
  0x25   : > { %v222_v43 = vld [vmem:[%s1419_s9 + $0x190] sm:$0xff]  ;;  %v223_v45 = vld [vmem:[%s1419_s9 + $0x198] sm:$0xff]  ;;  %v224_v47 = vld [vmem:[%s1419_s9 + $0x1a0] sm:$0xff] }
  0x26   : > { %1129 = vmatmul.mubr.msk.f32.gmra.mrb[6].mxu0 %vm247_vm0, %v179_v20  ;;  %v193_v48 = vld [vmem:[%s1419_s9 + $0xa8] sm:$0xff]  ;;  %v194_v50 = vld [vmem:[%s1419_s9 + $0xb0] sm:$0xff]  ;;  %v195_v52 = vld [vmem:[%s1419_s9 + $0xb8] sm:$0xff] }
  0x27   : > { %1177 = vmatmul.mubr.msk.f32.gmra.mrb[6].mxu1 %vm247_vm0, %v211_v21  ;;  %1131 = vmatprep.mubr.msk.f32.mxu0 %vm247_vm0, %v180_v22  ;;  %v225_v49 = vld [vmem:[%s1419_s9 + $0x1a8] sm:$0xff]  ;;  %v226_v51 = vld [vmem:[%s1419_s9 + $0x1b0] sm:$0xff]  ;;  %v227_v53 = vld [vmem:[%s1419_s9 + $0x1b8] sm:$0xff] }
  0x28   : > { %1179 = vmatprep.mubr.msk.f32.mxu1 %vm247_vm0, %v212_v23  ;;  %v196_v54 = vld [vmem:[%s1419_s9 + $0xc0] sm:$0xff]  ;;  %v197_v56 = vld [vmem:[%s1419_s9 + $0xc8] sm:$0xff]  ;;  %v198_v58 = vld [vmem:[%s1419_s9 + $0xd0] sm:$0xff] }
  0x29   : > { %v228_v55 = vld [vmem:[%s1419_s9 + $0x1c0] sm:$0xff]  ;;  %v229_v57 = vld [vmem:[%s1419_s9 + $0x1c8] sm:$0xff]  ;;  %v230_v59 = vld [vmem:[%s1419_s9 + $0x1d0] sm:$0xff] }
  0x2a   : > { %1132 = vmatmul.mubr.msk.f32.gmra.mrb[8].mxu0 %vm247_vm0, %v181_v24  ;;  %v199_v60 = vld [vmem:[%s1419_s9 + $0xd8] sm:$0xff]  ;;  %v200_v62 = vld [vmem:[%s1419_s9 + $0xe0] sm:$0xff]  ;;  %v201_v0 = vld [vmem:[%s1419_s9 + $0xe8] sm:$0xff] }
  0x2b   : > { %1180 = vmatmul.mubr.msk.f32.gmra.mrb[8].mxu1 %vm247_vm0, %v213_v25  ;;  %1134 = vmatprep.mubr.msk.f32.mxu0 %vm247_vm0, %v182_v26  ;;  %v231_v61 = vld [vmem:[%s1419_s9 + $0x1d8] sm:$0xff]  ;;  %v232_v63 = vld [vmem:[%s1419_s9 + $0x1e0] sm:$0xff]  ;;  %v233_v1 = vld [vmem:[%s1419_s9 + $0x1e8] sm:$0xff] }
  0x2c   : > { %1182 = vmatprep.mubr.msk.f32.mxu1 %vm247_vm0, %v214_v27  ;;  %v202_v2 = vld [vmem:[%s1419_s9 + $0xf0] sm:$0xff]  ;;  %v203_v4 = vld [vmem:[%s1419_s9 + $0xf8] sm:$0xff]  ;;  %v1555_v6 = vld [vmem:[%s1741_s2] ss:$0 sm:$0xff] }
  0x2d   : > { %v234_v3 = vld [vmem:[%s1419_s9 + $0x1f0] sm:$0xff]  ;;  %v235_v5 = vld [vmem:[%s1419_s9 + $0x1f8] sm:$0xff] }
  0x2e   : > { %1135 = vmatmul.mubr.msk.f32.gmra.mrb[10].mxu0 %vm247_vm0, %v183_v28 }
  0x2f   : > { %1183 = vmatmul.mubr.msk.f32.gmra.mrb[10].mxu1 %vm247_vm0, %v215_v29  ;;  %1137 = vmatprep.mubr.msk.f32.mxu0 %vm247_vm0, %v184_v30 }
  0x30   : > { %1185 = vmatprep.mubr.msk.f32.mxu1 %vm247_vm0, %v216_v31 }
  0x32   : > { %1138 = vmatmul.mubr.msk.f32.gmra.mrb[12].mxu0 %vm247_vm0, %v185_v32 }
  0x33   : > { %1186 = vmatmul.mubr.msk.f32.gmra.mrb[12].mxu1 %vm247_vm0, %v217_v33  ;;  %1140 = vmatprep.mubr.msk.f32.mxu0 %vm247_vm0, %v186_v34 }
  0x34   : > { %1188 = vmatprep.mubr.msk.f32.mxu1 %vm247_vm0, %v218_v35 }
  0x36   : > { %1141 = vmatmul.mubr.msk.f32.gmra.mrb[14].mxu0 %vm247_vm0, %v187_v36 }
  0x37   : > { %1189 = vmatmul.mubr.msk.f32.gmra.mrb[14].mxu1 %vm247_vm0, %v219_v37  ;;  %1143 = vmatprep.mubr.msk.f32.mxu0 %vm247_vm0, %v188_v38 }
  0x38   : > { %1191 = vmatprep.mubr.msk.f32.mxu1 %vm247_vm0, %v220_v39 }
  0x3a   : > { %1144 = vmatmul.mubr.msk.f32.gmra.mrb[16].mxu0 %vm247_vm0, %v189_v40 }
  0x3b   : > { %1192 = vmatmul.mubr.msk.f32.gmra.mrb[16].mxu1 %vm247_vm0, %v221_v41  ;;  %1146 = vmatprep.mubr.msk.f32.mxu0 %vm247_vm0, %v190_v42 }
  0x3c   : > { %1194 = vmatprep.mubr.msk.f32.mxu1 %vm247_vm0, %v222_v43 }
  0x3e   : > { %1147 = vmatmul.mubr.msk.f32.gmra.mrb[18].mxu0 %vm247_vm0, %v191_v44 }
  0x3f   : > { %1195 = vmatmul.mubr.msk.f32.gmra.mrb[18].mxu1 %vm247_vm0, %v223_v45  ;;  %1149 = vmatprep.mubr.msk.f32.mxu0 %vm247_vm0, %v192_v46 }
  0x40   : > { %1197 = vmatprep.mubr.msk.f32.mxu1 %vm247_vm0, %v224_v47 }
  0x42   : > { %1150 = vmatmul.mubr.msk.f32.gmra.mrb[20].mxu0 %vm247_vm0, %v193_v48 }
  0x43   : > { %1198 = vmatmul.mubr.msk.f32.gmra.mrb[20].mxu1 %vm247_vm0, %v225_v49  ;;  %1152 = vmatprep.mubr.msk.f32.mxu0 %vm247_vm0, %v194_v50 }
  0x44   : > { %1200 = vmatprep.mubr.msk.f32.mxu1 %vm247_vm0, %v226_v51 }
  0x46   : > { %1153 = vmatmul.mubr.msk.f32.gmra.mrb[22].mxu0 %vm247_vm0, %v195_v52 }
  0x47   : > { %1201 = vmatmul.mubr.msk.f32.gmra.mrb[22].mxu1 %vm247_vm0, %v227_v53  ;;  %1155 = vmatprep.mubr.msk.f32.mxu0 %vm247_vm0, %v196_v54 }
  0x48   : > { %1203 = vmatprep.mubr.msk.f32.mxu1 %vm247_vm0, %v228_v55 }
  0x4a   : > { %1156 = vmatmul.mubr.msk.f32.gmra.mrb[24].mxu0 %vm247_vm0, %v197_v56 }
  0x4b   : > { %1204 = vmatmul.mubr.msk.f32.gmra.mrb[24].mxu1 %vm247_vm0, %v229_v57  ;;  %1158 = vmatprep.mubr.msk.f32.mxu0 %vm247_vm0, %v198_v58 }
  0x4c   : > { %1206 = vmatprep.mubr.msk.f32.mxu1 %vm247_vm0, %v230_v59 }
  0x4e   : > { %1159 = vmatmul.mubr.msk.f32.gmra.mrb[26].mxu0 %vm247_vm0, %v199_v60 }
  0x4f   : > { %1207 = vmatmul.mubr.msk.f32.gmra.mrb[26].mxu1 %vm247_vm0, %v231_v61  ;;  %1161 = vmatprep.mubr.msk.f32.mxu0 %vm247_vm0, %v200_v62 }
  0x50   : > { %1209 = vmatprep.mubr.msk.f32.mxu1 %vm247_vm0, %v232_v63 }
  0x52   : > { %1162 = vmatmul.mubr.msk.f32.gmra.mrb[28].mxu0 %vm247_vm0, %v201_v0 }
  0x53   : > { %1210 = vmatmul.mubr.msk.f32.gmra.mrb[28].mxu1 %vm247_vm0, %v233_v1  ;;  %1164 = vmatprep.mubr.msk.f32.mxu0 %vm247_vm0, %v202_v2 }
  0x54   : > { %1212 = vmatprep.mubr.msk.f32.mxu1 %vm247_vm0, %v234_v3 }
  0x56   : > { %1165 = vmatmul.mubr.msk.f32.gmra.mrb[30].mxu0 %vm247_vm0, %v203_v4 }
  0x57   : > { %1213 = vmatmul.mubr.msk.f32.gmra.mrb[30].mxu1 %vm247_vm0, %v235_v5 }
  0xed   : > { %v1121_v7 = vpop.f32.mrb[0].mxu0 }
  0xee   : > { %v1169_v8 = vpop.f32.mrb[0].mxu1  ;;  %v512_v9 = vadd.f32 %v1121_v7, %v1555_v6  ;;  %v506_v11 = vpop.f32.mrb[1].mxu0 }
  0xef   : > { %v672_v10 = vadd.f32 %v1169_v8, %v1555_v6  ;;  %v666_v12 = vpop.f32.mrb[1].mxu1  ;;  %v507_v13 = vadd.f32 %v1555_v6, %v506_v11 }
  0xf0   : > { %v667_v14 = vadd.f32 %v1555_v6, %v666_v12  ;;  %826 = vst [vmem:[%s1561_s20 + $0x8] sm:$0xff] %v512_v9 }
  0xf1   : > { %858 = vst [vmem:[%s1561_s20 + $0x108] sm:$0xff] %v672_v10  ;;  %825 = vst [vmem:[%s1561_s20] sm:$0xff] %v507_v13  ;;  %v1124_v15 = vpop.f32.mrb[2].mxu0 }
  0xf2   : > { %857 = vst [vmem:[%s1561_s20 + $0x100] sm:$0xff] %v667_v14  ;;  %v1172_v16 = vpop.f32.mrb[2].mxu1  ;;  %v522_v17 = vadd.f32 %v1124_v15, %v1555_v6  ;;  %v516_v19 = vpop.f32.mrb[3].mxu0 }
  0xf3   : > { %v682_v18 = vadd.f32 %v1172_v16, %v1555_v6  ;;  %v676_v20 = vpop.f32.mrb[3].mxu1  ;;  %v517_v21 = vadd.f32 %v1555_v6, %v516_v19 }
  0xf4   : > { %v677_v22 = vadd.f32 %v1555_v6, %v676_v20  ;;  %828 = vst [vmem:[%s1561_s20 + $0x18] sm:$0xff] %v522_v17 }
  0xf5   : > { %860 = vst [vmem:[%s1561_s20 + $0x118] sm:$0xff] %v682_v18  ;;  %827 = vst [vmem:[%s1561_s20 + $0x10] sm:$0xff] %v517_v21  ;;  %v1127_v23 = vpop.f32.mrb[4].mxu0 }
  0xf6   : > { %859 = vst [vmem:[%s1561_s20 + $0x110] sm:$0xff] %v677_v22  ;;  %v1175_v24 = vpop.f32.mrb[4].mxu1  ;;  %v532_v25 = vadd.f32 %v1127_v23, %v1555_v6  ;;  %v526_v27 = vpop.f32.mrb[5].mxu0 }
  0xf7   : > { %v692_v26 = vadd.f32 %v1175_v24, %v1555_v6  ;;  %v686_v28 = vpop.f32.mrb[5].mxu1  ;;  %v527_v29 = vadd.f32 %v1555_v6, %v526_v27 }
  0xf8   : > { %v687_v30 = vadd.f32 %v1555_v6, %v686_v28  ;;  %830 = vst [vmem:[%s1561_s20 + $0x28] sm:$0xff] %v532_v25 }
  0xf9   : > { %862 = vst [vmem:[%s1561_s20 + $0x128] sm:$0xff] %v692_v26  ;;  %829 = vst [vmem:[%s1561_s20 + $0x20] sm:$0xff] %v527_v29  ;;  %v1130_v31 = vpop.f32.mrb[6].mxu0 }
  0xfa   : > { %861 = vst [vmem:[%s1561_s20 + $0x120] sm:$0xff] %v687_v30  ;;  %v1178_v32 = vpop.f32.mrb[6].mxu1  ;;  %v542_v33 = vadd.f32 %v1130_v31, %v1555_v6  ;;  %v536_v35 = vpop.f32.mrb[7].mxu0 }
  0xfb   : > { %v702_v34 = vadd.f32 %v1178_v32, %v1555_v6  ;;  %v696_v36 = vpop.f32.mrb[7].mxu1  ;;  %v537_v37 = vadd.f32 %v1555_v6, %v536_v35 }
  0xfc   : > { %v697_v38 = vadd.f32 %v1555_v6, %v696_v36  ;;  %832 = vst [vmem:[%s1561_s20 + $0x38] sm:$0xff] %v542_v33 }
  0xfd   : > { %864 = vst [vmem:[%s1561_s20 + $0x138] sm:$0xff] %v702_v34  ;;  %831 = vst [vmem:[%s1561_s20 + $0x30] sm:$0xff] %v537_v37  ;;  %v1133_v39 = vpop.f32.mrb[8].mxu0 }
  0xfe   : > { %863 = vst [vmem:[%s1561_s20 + $0x130] sm:$0xff] %v697_v38  ;;  %v1181_v40 = vpop.f32.mrb[8].mxu1  ;;  %v552_v41 = vadd.f32 %v1133_v39, %v1555_v6  ;;  %v546_v43 = vpop.f32.mrb[9].mxu0 }
  0xff   : > { %v712_v42 = vadd.f32 %v1181_v40, %v1555_v6  ;;  %v706_v44 = vpop.f32.mrb[9].mxu1  ;;  %v547_v45 = vadd.f32 %v1555_v6, %v546_v43 }
 0x100   : > { %v707_v46 = vadd.f32 %v1555_v6, %v706_v44  ;;  %834 = vst [vmem:[%s1561_s20 + $0x48] sm:$0xff] %v552_v41 }
 0x101   : > { %866 = vst [vmem:[%s1561_s20 + $0x148] sm:$0xff] %v712_v42  ;;  %833 = vst [vmem:[%s1561_s20 + $0x40] sm:$0xff] %v547_v45  ;;  %v1136_v47 = vpop.f32.mrb[10].mxu0 }
 0x102   : > { %865 = vst [vmem:[%s1561_s20 + $0x140] sm:$0xff] %v707_v46  ;;  %v1184_v48 = vpop.f32.mrb[10].mxu1  ;;  %v562_v49 = vadd.f32 %v1136_v47, %v1555_v6  ;;  %v556_v51 = vpop.f32.mrb[11].mxu0 }
 0x103   : > { %v722_v50 = vadd.f32 %v1184_v48, %v1555_v6  ;;  %v716_v52 = vpop.f32.mrb[11].mxu1  ;;  %v557_v53 = vadd.f32 %v1555_v6, %v556_v51 }
 0x104   : > { %v717_v54 = vadd.f32 %v1555_v6, %v716_v52  ;;  %836 = vst [vmem:[%s1561_s20 + $0x58] sm:$0xff] %v562_v49 }
 0x105   : > { %868 = vst [vmem:[%s1561_s20 + $0x158] sm:$0xff] %v722_v50  ;;  %835 = vst [vmem:[%s1561_s20 + $0x50] sm:$0xff] %v557_v53  ;;  %v1139_v55 = vpop.f32.mrb[12].mxu0 }
 0x106   : > { %867 = vst [vmem:[%s1561_s20 + $0x150] sm:$0xff] %v717_v54  ;;  %v1187_v56 = vpop.f32.mrb[12].mxu1  ;;  %v572_v57 = vadd.f32 %v1139_v55, %v1555_v6  ;;  %v566_v59 = vpop.f32.mrb[13].mxu0 }
 0x107   : > { %v732_v58 = vadd.f32 %v1187_v56, %v1555_v6  ;;  %v726_v60 = vpop.f32.mrb[13].mxu1  ;;  %v567_v61 = vadd.f32 %v1555_v6, %v566_v59 }
 0x108   : > { %v727_v62 = vadd.f32 %v1555_v6, %v726_v60  ;;  %838 = vst [vmem:[%s1561_s20 + $0x68] sm:$0xff] %v572_v57 }
 0x109   : > { %870 = vst [vmem:[%s1561_s20 + $0x168] sm:$0xff] %v732_v58  ;;  %837 = vst [vmem:[%s1561_s20 + $0x60] sm:$0xff] %v567_v61  ;;  %v1142_v63 = vpop.f32.mrb[14].mxu0 }
 0x10a   : > { %869 = vst [vmem:[%s1561_s20 + $0x160] sm:$0xff] %v727_v62  ;;  %v1190_v0 = vpop.f32.mrb[14].mxu1  ;;  %v582_v1 = vadd.f32 %v1142_v63, %v1555_v6  ;;  %v576_v3 = vpop.f32.mrb[15].mxu0 }
 0x10b   : > { %v742_v2 = vadd.f32 %v1190_v0, %v1555_v6  ;;  %v736_v4 = vpop.f32.mrb[15].mxu1  ;;  %v577_v5 = vadd.f32 %v1555_v6, %v576_v3 }
 0x10c   : > { %v737_v7 = vadd.f32 %v1555_v6, %v736_v4  ;;  %840 = vst [vmem:[%s1561_s20 + $0x78] sm:$0xff] %v582_v1 }
 0x10d   : > { %872 = vst [vmem:[%s1561_s20 + $0x178] sm:$0xff] %v742_v2  ;;  %839 = vst [vmem:[%s1561_s20 + $0x70] sm:$0xff] %v577_v5  ;;  %v1145_v8 = vpop.f32.mrb[16].mxu0 }
 0x10e   : > { %871 = vst [vmem:[%s1561_s20 + $0x170] sm:$0xff] %v737_v7  ;;  %v1193_v9 = vpop.f32.mrb[16].mxu1  ;;  %v592_v10 = vadd.f32 %v1145_v8, %v1555_v6  ;;  %v586_v12 = vpop.f32.mrb[17].mxu0 }
 0x10f   : > { %v752_v11 = vadd.f32 %v1193_v9, %v1555_v6  ;;  %v746_v13 = vpop.f32.mrb[17].mxu1  ;;  %v587_v14 = vadd.f32 %v1555_v6, %v586_v12 }
 0x110   : > { %v747_v15 = vadd.f32 %v1555_v6, %v746_v13  ;;  %842 = vst [vmem:[%s1561_s20 + $0x88] sm:$0xff] %v592_v10 }
 0x111   : > { %874 = vst [vmem:[%s1561_s20 + $0x188] sm:$0xff] %v752_v11  ;;  %841 = vst [vmem:[%s1561_s20 + $0x80] sm:$0xff] %v587_v14  ;;  %v1148_v16 = vpop.f32.mrb[18].mxu0 }
 0x112   : > { %873 = vst [vmem:[%s1561_s20 + $0x180] sm:$0xff] %v747_v15  ;;  %v1196_v17 = vpop.f32.mrb[18].mxu1  ;;  %v602_v18 = vadd.f32 %v1148_v16, %v1555_v6  ;;  %v596_v20 = vpop.f32.mrb[19].mxu0 }
 0x113   : > { %v762_v19 = vadd.f32 %v1196_v17, %v1555_v6  ;;  %v756_v21 = vpop.f32.mrb[19].mxu1  ;;  %v597_v22 = vadd.f32 %v1555_v6, %v596_v20 }
 0x114   : > { %v757_v23 = vadd.f32 %v1555_v6, %v756_v21  ;;  %844 = vst [vmem:[%s1561_s20 + $0x98] sm:$0xff] %v602_v18 }
 0x115   : > { %876 = vst [vmem:[%s1561_s20 + $0x198] sm:$0xff] %v762_v19  ;;  %843 = vst [vmem:[%s1561_s20 + $0x90] sm:$0xff] %v597_v22  ;;  %v1151_v24 = vpop.f32.mrb[20].mxu0 }
 0x116   : > { %875 = vst [vmem:[%s1561_s20 + $0x190] sm:$0xff] %v757_v23  ;;  %v1199_v25 = vpop.f32.mrb[20].mxu1  ;;  %v612_v26 = vadd.f32 %v1151_v24, %v1555_v6  ;;  %v606_v28 = vpop.f32.mrb[21].mxu0 }
 0x117   : > { %v772_v27 = vadd.f32 %v1199_v25, %v1555_v6  ;;  %v766_v29 = vpop.f32.mrb[21].mxu1  ;;  %v607_v30 = vadd.f32 %v1555_v6, %v606_v28 }
 0x118   : > { %v767_v31 = vadd.f32 %v1555_v6, %v766_v29  ;;  %846 = vst [vmem:[%s1561_s20 + $0xa8] sm:$0xff] %v612_v26 }
 0x119   : > { %878 = vst [vmem:[%s1561_s20 + $0x1a8] sm:$0xff] %v772_v27  ;;  %845 = vst [vmem:[%s1561_s20 + $0xa0] sm:$0xff] %v607_v30  ;;  %v1154_v32 = vpop.f32.mrb[22].mxu0 }
 0x11a   : > { %877 = vst [vmem:[%s1561_s20 + $0x1a0] sm:$0xff] %v767_v31  ;;  %v1202_v33 = vpop.f32.mrb[22].mxu1  ;;  %v622_v34 = vadd.f32 %v1154_v32, %v1555_v6  ;;  %v616_v36 = vpop.f32.mrb[23].mxu0 }
 0x11b   : > { %v782_v35 = vadd.f32 %v1202_v33, %v1555_v6  ;;  %v776_v37 = vpop.f32.mrb[23].mxu1  ;;  %v617_v38 = vadd.f32 %v1555_v6, %v616_v36 }
 0x11c   : > { %v777_v39 = vadd.f32 %v1555_v6, %v776_v37  ;;  %848 = vst [vmem:[%s1561_s20 + $0xb8] sm:$0xff] %v622_v34 }
 0x11d   : > { %880 = vst [vmem:[%s1561_s20 + $0x1b8] sm:$0xff] %v782_v35  ;;  %847 = vst [vmem:[%s1561_s20 + $0xb0] sm:$0xff] %v617_v38  ;;  %v1157_v40 = vpop.f32.mrb[24].mxu0 }
 0x11e   : > { %879 = vst [vmem:[%s1561_s20 + $0x1b0] sm:$0xff] %v777_v39  ;;  %v1205_v41 = vpop.f32.mrb[24].mxu1  ;;  %v632_v42 = vadd.f32 %v1157_v40, %v1555_v6  ;;  %v626_v44 = vpop.f32.mrb[25].mxu0 }
 0x11f   : > { %v792_v43 = vadd.f32 %v1205_v41, %v1555_v6  ;;  %v786_v45 = vpop.f32.mrb[25].mxu1  ;;  %v627_v46 = vadd.f32 %v1555_v6, %v626_v44 }
 0x120   : > { %v787_v47 = vadd.f32 %v1555_v6, %v786_v45  ;;  %850 = vst [vmem:[%s1561_s20 + $0xc8] sm:$0xff] %v632_v42 }
 0x121   : > { %882 = vst [vmem:[%s1561_s20 + $0x1c8] sm:$0xff] %v792_v43  ;;  %849 = vst [vmem:[%s1561_s20 + $0xc0] sm:$0xff] %v627_v46  ;;  %v1160_v48 = vpop.f32.mrb[26].mxu0 }
 0x122   : > { %881 = vst [vmem:[%s1561_s20 + $0x1c0] sm:$0xff] %v787_v47  ;;  %v1208_v49 = vpop.f32.mrb[26].mxu1  ;;  %v642_v50 = vadd.f32 %v1160_v48, %v1555_v6  ;;  %v636_v52 = vpop.f32.mrb[27].mxu0 }
 0x123   : > { %v802_v51 = vadd.f32 %v1208_v49, %v1555_v6  ;;  %v796_v53 = vpop.f32.mrb[27].mxu1  ;;  %v637_v54 = vadd.f32 %v1555_v6, %v636_v52 }
 0x124   : > { %v797_v55 = vadd.f32 %v1555_v6, %v796_v53  ;;  %852 = vst [vmem:[%s1561_s20 + $0xd8] sm:$0xff] %v642_v50 }
 0x125   : > { %884 = vst [vmem:[%s1561_s20 + $0x1d8] sm:$0xff] %v802_v51  ;;  %851 = vst [vmem:[%s1561_s20 + $0xd0] sm:$0xff] %v637_v54  ;;  %v1163_v56 = vpop.f32.mrb[28].mxu0 }
 0x126   : > { %883 = vst [vmem:[%s1561_s20 + $0x1d0] sm:$0xff] %v797_v55  ;;  %v1211_v57 = vpop.f32.mrb[28].mxu1  ;;  %v652_v58 = vadd.f32 %v1163_v56, %v1555_v6  ;;  %v646_v60 = vpop.f32.mrb[29].mxu0 }
 0x127   : > { %v812_v59 = vadd.f32 %v1211_v57, %v1555_v6  ;;  %v806_v61 = vpop.f32.mrb[29].mxu1  ;;  %v647_v62 = vadd.f32 %v1555_v6, %v646_v60 }
 0x128   : > { %v807_v63 = vadd.f32 %v1555_v6, %v806_v61  ;;  %854 = vst [vmem:[%s1561_s20 + $0xe8] sm:$0xff] %v652_v58 }
 0x129   : > { %886 = vst [vmem:[%s1561_s20 + $0x1e8] sm:$0xff] %v812_v59  ;;  %853 = vst [vmem:[%s1561_s20 + $0xe0] sm:$0xff] %v647_v62  ;;  %v1166_v0 = vpop.f32.mrb[30].mxu0 }
 0x12a   : > { %885 = vst [vmem:[%s1561_s20 + $0x1e0] sm:$0xff] %v807_v63  ;;  %v1214_v1 = vpop.f32.mrb[30].mxu1  ;;  %v662_v2 = vadd.f32 %v1166_v0, %v1555_v6  ;;  %v656_v4 = vpop.f32.mrb[31].mxu0 }
 0x12b   : > { %v822_v3 = vadd.f32 %v1214_v1, %v1555_v6  ;;  %v816_v5 = vpop.f32.mrb[31].mxu1  ;;  %v657_v7 = vadd.f32 %v1555_v6, %v656_v4 }
 0x12c   : > { %v817_v8 = vadd.f32 %v1555_v6, %v816_v5  ;;  %856 = vst [vmem:[%s1561_s20 + $0xf8] sm:$0xff] %v662_v2 }
 0x12d   : > { %888 = vst [vmem:[%s1561_s20 + $0x1f8] sm:$0xff] %v822_v3  ;;  %855 = vst [vmem:[%s1561_s20 + $0xf0] sm:$0xff] %v657_v7 }
 0x12e   : > { %887 = vst [vmem:[%s1561_s20 + $0x1f0] sm:$0xff] %v817_v8 }
 0x12f   : > { %1281 = shalt.err (!%p1278_p3)
}
 0x130   : > { %s1282_s6 = scalar_lea.hbm %s1686_s27, 8192  ;;  %s1286_s9 = scalar_lea.hbm %s1742_s3, 16384 }
 0x131   : > { %p1283_p4 = scmp.ne.s32.totalorder %s1686_s27, %s1282_s6  ;;  %p1287_p9 = scmp.lt.u32.totalorder %s1686_s27, %s1742_s3 }
 0x132   : > { %p1288_p10 = scmp.lt.u32.totalorder %s1286_s9, %s1282_s6  ;;  %p1290_p12 = scmp.lt.u32.totalorder %s1282_s6, %s1686_s27 }
 0x133   : > { %p1284_p7 = pnand %p1283_p4, %p1393_p5 }
 0x134   : > { %p1289_p11 = por %p1288_p10, %p1287_p9 }
 0x135   : > { %p1285_p8 = pneg %p1284_p7 }
 0x136   : > { %p1291_p13 = por %p1290_p12, %p1289_p11 }
 0x138   : > { %p1292_p0 = pnand %p1291_p13, %p1285_p8 }
 0x13a   : > { %1295 = shalt.err (!%p1292_p0)
}
 0x13b   : > { %s1333_s17 = smov 128   ;;  %s1334_s19 = smov 8  }
 0x13c   : > { %1227 = dma.vmem_to_hbm [thread:$0]  (%p1393_p5), %s1688_s25, 8192, %s1686_s27, %s1698_s28, %s1333_s17, %s1333_s17, %s1334_s19  }
 0x13d PF: > { %p1233_p1 = scmp.ge.s32.totalorder %s1330_s15, 2  ;;  %s918_s20 = sand.u32 1, %s1318_s12  }
 0x13e   : > { %s919_s24 = scalar_lea.sflag [#allocation3], %s918_s20 }
 0x13f   : > { %p1230_p2 = pnand %p1233_p1, %p1397_p6 }
 0x141   : > { %1313 = dma.done.wait (!%p1230_p2), %s919_s24, 8192  }
 0x142   : > { %1315 = vsyncadd (!%p1230_p2), %s919_s24, 4294959104  ;;  %p13_p3 = scmp.ge.s32.totalorder %s1380_s18, 4   ;;  %s1745_s12 = smov %s1322_s13 }
 0x143   : > { %s1746_s13 = smov %s1326_s14  ;;  %s1747_s14 = smov %s1391_s21 }
 0x144   : > { %s1748_s15 = smov %s1380_s18  ;;  %15 = sbr.rel (!%p13_p3) target bundleno = 3 (0x3), region = 67 }
 0x14b   :  { %924 = vsyncpa [#allocation3], 1 }
 0x14c   :  { %926 = vsyncpa [#allocation3 + $0x1], 1 }

</bundles_post_ra>
